<compile_context>
chip_gen: v7x
topology: tpu7x:2x2x1
jax: 0.10.0
libtpu: 0.0.40
codegen_flags: <defaults>
</compile_context>

<pallas_src>
import jax
import jax.numpy as jnp
from jax.experimental import pallas as pl
from jax.experimental.pallas import tpu as pltpu

LATENT_DIM = 512
TILE_B = 2048           # large batch tile: amortizes per-grid-step overhead
_MAX_SMALL_TILE = 1024  # at/below this, run the whole (padded) batch as one tile


def _discriminator_kernel(x_ref,
                          w1_ref, b1_ref,
                          w2_ref, b2_ref,
                          w3_ref, b3_ref,
                          w4_ref, b4_ref,
                          o_ref):
    # Layer 1: (TB,512) @ (512,512) + (1,512) -> ReLU   (bf16 MXU, f32 accum)
    h = jnp.dot(x_ref[...], w1_ref[...], preferred_element_type=jnp.float32)
    h = jnp.maximum(h + b1_ref[...], 0.0)
    # Layer 2: (TB,512) @ (512,256) + (1,256) -> ReLU
    h = jnp.dot(h.astype(jnp.bfloat16), w2_ref[...],
                preferred_element_type=jnp.float32)
    h = jnp.maximum(h + b2_ref[...], 0.0)
    # Layer 3: (TB,256) @ (256,128) + (1,128) -> ReLU
    h = jnp.dot(h.astype(jnp.bfloat16), w3_ref[...],
                preferred_element_type=jnp.float32)
    h = jnp.maximum(h + b3_ref[...], 0.0)
    # Layer 4: 128 -> 1.  An N=1 matmul wastes the MXU; do a VPU multiply +
    # XLU lane reduction instead (f32 elementwise so v5e's VPU is happy).
    logits = jnp.sum(h * w4_ref[...].astype(jnp.float32),
                     axis=-1, keepdims=True)
    logits = logits + b4_ref[...]
    # Sigmoid: EUP exp + approx reciprocal.  Note: approx recip has ~1e-3 rel
    # error and may land marginally outside [0,1]; use exact 1/x if downstream
    # assumes a strict sigmoid range.
    o_ref[...] = pl.reciprocal(1.0 + jnp.exp(-logits), approx=True)
    # TODO(synk): lane-dense (1, tb) output layout and Buffered(1) resident
    # weight blocks are small (<5%) wins deliberately skipped to keep the
    # store path / BlockSpecs simple and robust.


def _round_up(x, m):
    return -(-x // m) * m


def _pick_tile(batch):
    """Pick the batch tile: right-sized for small B, large & evenly split for big B."""
    b_pad = _round_up(batch, 8)          # sublane multiple for the block shape
    if b_pad <= _MAX_SMALL_TILE:
        return b_pad                     # one tile, no wasted padding rows
    # Even number of large tiles so v7x's two TensorCores get equal work.
    n_tiles = _round_up(pl.cdiv(b_pad, TILE_B), 2)
    return min(TILE_B, _round_up(pl.cdiv(b_pad, n_tiles), 256))


def discriminator_forward(x, params, *, tb=None):
    """x: (B, 512) -> (B, 1) float32, fully fused in one Pallas kernel."""
    B = x.shape[0]
    (w1, b1), (w2, b2), (w3, b3), (w4, b4) = params

    if tb is None:
        tb = _pick_tile(B)

    # bf16 activations + weights: halves the HBM x stream (the dominant read),
    # feeds the bf16 MXU at full rate.  In a real pipeline the producer should
    # emit bf16 x directly; the cast here is a fallback for f32 callers.
    xb = x if x.dtype == jnp.bfloat16 else x.astype(jnp.bfloat16)
    w1b = w1.astype(jnp.bfloat16)
    w2b = w2.astype(jnp.bfloat16)
    w3b = w3.astype(jnp.bfloat16)
    w4row = w4.T.astype(jnp.bfloat16)    # (1, 128): final layer runs on the VPU

    flops = 2 * B * (512 * 512 + 512 * 256 + 256 * 128 + 128)
    bytes_accessed = (
        xb.size * 2 + B * 4                                   # bf16 x in, f32 out
        + (w1b.size + w2b.size + w3b.size + w4row.size) * 2   # bf16 weights
        + (b1.size + b2.size + b3.size + b4.size) * 4)        # f32 biases

    def resident(shape):
        # Same block (0,0) every grid step -> fetched once, stays VMEM-resident.
        return pl.BlockSpec(shape, lambda i: (0, 0))

    return pl.pallas_call(
        _discriminator_kernel,
        out_shape=jax.ShapeDtypeStruct((B, 1), jnp.float32),
        grid=(pl.cdiv(B, tb),),
        in_specs=[
            pl.BlockSpec((tb, LATENT_DIM), lambda i: (i, 0)),   # x: streamed
            resident((LATENT_DIM, 512)), resident((1, 512)),    # layer 1
            resident((512, 256)),        resident((1, 256)),    # layer 2
            resident((256, 128)),        resident((1, 128)),    # layer 3
            resident((1, 128)),          resident((1, 1)),      # layer 4
        ],
        out_specs=pl.BlockSpec((tb, 1), lambda i: (i, 0)),
        compiler_params=pltpu.CompilerParams(
            dimension_semantics=("parallel",),
            # v5e default scoped VMEM is only 16 MiB; the 2048-row schedule
            # needs ~16 MiB of x/intermediate/weight buffers.  48 MiB is safe
            # on v5e/v6e (128 MiB physical) and within v7x's 64 MiB physical.
            vmem_limit_bytes=48 * 1024 * 1024),
        cost_estimate=pl.CostEstimate(
            flops=flops, transcendentals=B, bytes_accessed=bytes_accessed),
    )(xb, w1b, b1, w2b, b2, w3b, b3, w4row, b4)


def init_params(key):
    """PyTorch nn.Linear-style init (uniform +/- 1/sqrt(fan_in)), stored (in, out)."""
    dims = [(LATENT_DIM, 512), (512, 256), (256, 128), (128, 1)]
    params = []
    for fan_in, fan_out in dims:
        key, kw, kb = jax.random.split(key, 3)
        bound = 1.0 / jnp.sqrt(fan_in)
        w = jax.random.uniform(kw, (fan_in, fan_out), jnp.float32, -bound, bound)
        b = jax.random.uniform(kb, (1, fan_out), jnp.float32, -bound, bound)
        params.append((w, b))
    return params


def reference_forward(x, params):
    """Pure-JAX f32 reference following the same bf16 rounding points as the kernel."""
    h = x.astype(jnp.bfloat16).astype(jnp.float32)
    for i, (w, b) in enumerate(params):
        w = w.astype(jnp.bfloat16).astype(jnp.float32)
        h = h @ w + b
        if i < 3:
            h = jnp.maximum(h, 0.0)
            h = h.astype(jnp.bfloat16).astype(jnp.float32)
    return jax.nn.sigmoid(h)


if __name__ == "__main__":
    key = jax.random.PRNGKey(0)
    kx, kp = jax.random.split(key)

    batch = 8
    x = jax.random.normal(kx, (batch, LATENT_DIM), jnp.float32)
    params = init_params(kp)

    out = jax.block_until_ready(discriminator_forward(x, params))
    ref = reference_forward(x, params)

    assert out.shape == (batch, 1)
    assert bool(jnp.all(jnp.isfinite(out)))
    # Tolerance loosened vs an all-f32 path because x/weights/activations go
    # through bf16 on the MXU path and the sigmoid uses an approx reciprocal.
    assert jnp.allclose(out, ref, atol=2e-2, rtol=2e-2), (
        f"max abs err = {jnp.max(jnp.abs(out - ref))}")

    print("KERNEL_OK")
</pallas_src>

<mosaic_0001>
module attributes {stable_mosaic.version = 11 : i64} {
  func.func @_discriminator_kernel(%arg0: i32, %arg1: memref<8x512xbf16, #tpu.memory_space<vmem>>, %arg2: memref<512x512xbf16, #tpu.memory_space<vmem>>, %arg3: memref<1x512xf32, #tpu.memory_space<vmem>>, %arg4: memref<512x256xbf16, #tpu.memory_space<vmem>>, %arg5: memref<1x256xf32, #tpu.memory_space<vmem>>, %arg6: memref<256x128xbf16, #tpu.memory_space<vmem>>, %arg7: memref<1x128xf32, #tpu.memory_space<vmem>>, %arg8: memref<1x128xbf16, #tpu.memory_space<vmem>>, %arg9: memref<1x1xf32, #tpu.memory_space<vmem>>, %arg10: memref<8x1xf32, #tpu.memory_space<vmem>>) attributes {dimension_semantics = [#tpu.dimension_semantics<parallel>], iteration_bounds = array<i64: 1>, scalar_prefetch = 0 : i64, scratch_operands = 0 : i64, tpu.core_type = #tpu.core_type<tc>, window_params = [{transform_indices = @transform_0, window_bounds = array<i64: 8, 512>}, {pipeline_mode = #tpu.pipeline_mode<synchronous>, transform_indices = @transform_1, window_bounds = array<i64: 512, 512>}, {pipeline_mode = #tpu.pipeline_mode<synchronous>, transform_indices = @transform_2, window_bounds = array<i64: 1, 512>}, {pipeline_mode = #tpu.pipeline_mode<synchronous>, transform_indices = @transform_3, window_bounds = array<i64: 512, 256>}, {pipeline_mode = #tpu.pipeline_mode<synchronous>, transform_indices = @transform_4, window_bounds = array<i64: 1, 256>}, {pipeline_mode = #tpu.pipeline_mode<synchronous>, transform_indices = @transform_5, window_bounds = array<i64: 256, 128>}, {pipeline_mode = #tpu.pipeline_mode<synchronous>, transform_indices = @transform_6, window_bounds = array<i64: 1, 128>}, {pipeline_mode = #tpu.pipeline_mode<synchronous>, transform_indices = @transform_7, window_bounds = array<i64: 1, 128>}, {pipeline_mode = #tpu.pipeline_mode<synchronous>, transform_indices = @transform_8, window_bounds = array<i64: 1, 1>}, {transform_indices = @transform_9, window_bounds = array<i64: 8, 1>}]} {
    %c0 = arith.constant 0 : index
    %c0_0 = arith.constant 0 : index
    %0 = vector.load %arg1[%c0, %c0_0] : memref<8x512xbf16, #tpu.memory_space<vmem>>, vector<8x512xbf16>
    %c0_1 = arith.constant 0 : index
    %c0_2 = arith.constant 0 : index
    %1 = vector.load %arg2[%c0_1, %c0_2] : memref<512x512xbf16, #tpu.memory_space<vmem>>, vector<512x512xbf16>
    %cst = arith.constant dense<0.000000e+00> : vector<8x512xf32>
    %2 = tpu.matmul %0, %1, %cst {dimension_numbers = #tpu.dot_dimension_numbers<[1], [0], [0], [1], [0, 0, 1, 1], [], []>} : vector<8x512xbf16>, vector<512x512xbf16>, vector<8x512xf32> -> vector<8x512xf32>
    %c0_3 = arith.constant 0 : index
    %c0_4 = arith.constant 0 : index
    %3 = vector.load %arg3[%c0_3, %c0_4] : memref<1x512xf32, #tpu.memory_space<vmem>>, vector<1x512xf32>
    %4 = vector.broadcast %3 : vector<1x512xf32> to vector<8x512xf32>
    %5 = arith.addf %2, %4 : vector<8x512xf32>
    %cst_5 = arith.constant 0.000000e+00 : f32
    %6 = vector.broadcast %cst_5 : f32 to vector<8x512xf32>
    %7 = arith.maximumf %5, %6 : vector<8x512xf32>
    %8 = arith.truncf %7 : vector<8x512xf32> to vector<8x512xbf16>
    %c0_6 = arith.constant 0 : index
    %c0_7 = arith.constant 0 : index
    %9 = vector.load %arg4[%c0_6, %c0_7] : memref<512x256xbf16, #tpu.memory_space<vmem>>, vector<512x256xbf16>
    %cst_8 = arith.constant dense<0.000000e+00> : vector<8x256xf32>
    %10 = tpu.matmul %8, %9, %cst_8 {dimension_numbers = #tpu.dot_dimension_numbers<[1], [0], [0], [1], [0, 0, 1, 1], [], []>} : vector<8x512xbf16>, vector<512x256xbf16>, vector<8x256xf32> -> vector<8x256xf32>
    %c0_9 = arith.constant 0 : index
    %c0_10 = arith.constant 0 : index
    %11 = vector.load %arg5[%c0_9, %c0_10] : memref<1x256xf32, #tpu.memory_space<vmem>>, vector<1x256xf32>
    %12 = vector.broadcast %11 : vector<1x256xf32> to vector<8x256xf32>
    %13 = arith.addf %10, %12 : vector<8x256xf32>
    %cst_11 = arith.constant 0.000000e+00 : f32
    %14 = vector.broadcast %cst_11 : f32 to vector<8x256xf32>
    %15 = arith.maximumf %13, %14 : vector<8x256xf32>
    %16 = arith.truncf %15 : vector<8x256xf32> to vector<8x256xbf16>
    %c0_12 = arith.constant 0 : index
    %c0_13 = arith.constant 0 : index
    %17 = vector.load %arg6[%c0_12, %c0_13] : memref<256x128xbf16, #tpu.memory_space<vmem>>, vector<256x128xbf16>
    %cst_14 = arith.constant dense<0.000000e+00> : vector<8x128xf32>
    %18 = tpu.matmul %16, %17, %cst_14 {dimension_numbers = #tpu.dot_dimension_numbers<[1], [0], [0], [1], [0, 0, 1, 1], [], []>} : vector<8x256xbf16>, vector<256x128xbf16>, vector<8x128xf32> -> vector<8x128xf32>
    %c0_15 = arith.constant 0 : index
    %c0_16 = arith.constant 0 : index
    %19 = vector.load %arg7[%c0_15, %c0_16] : memref<1x128xf32, #tpu.memory_space<vmem>>, vector<1x128xf32>
    %20 = vector.broadcast %19 : vector<1x128xf32> to vector<8x128xf32>
    %21 = arith.addf %18, %20 : vector<8x128xf32>
    %cst_17 = arith.constant 0.000000e+00 : f32
    %22 = vector.broadcast %cst_17 : f32 to vector<8x128xf32>
    %23 = arith.maximumf %21, %22 : vector<8x128xf32>
    %c0_18 = arith.constant 0 : index
    %c0_19 = arith.constant 0 : index
    %24 = vector.load %arg8[%c0_18, %c0_19] : memref<1x128xbf16, #tpu.memory_space<vmem>>, vector<1x128xbf16>
    %25 = arith.extf %24 : vector<1x128xbf16> to vector<1x128xf32>
    %26 = vector.broadcast %25 : vector<1x128xf32> to vector<8x128xf32>
    %27 = arith.mulf %23, %26 : vector<8x128xf32>
    %cst_20 = arith.constant dense<0.000000e+00> : vector<8xf32>
    %28 = vector.multi_reduction <add>, %27, %cst_20 [1] : vector<8x128xf32> to vector<8xf32>
    %29 = vector.shape_cast %28 : vector<8xf32> to vector<8x1xf32>
    %c0_21 = arith.constant 0 : index
    %c0_22 = arith.constant 0 : index
    %30 = vector.load %arg9[%c0_21, %c0_22] : memref<1x1xf32, #tpu.memory_space<vmem>>, vector<1x1xf32>
    %31 = vector.broadcast %30 : vector<1x1xf32> to vector<8x1xf32>
    %32 = arith.addf %29, %31 : vector<8x1xf32>
    %cst_23 = arith.constant 0.000000e+00 : f32
    %33 = vector.broadcast %cst_23 : f32 to vector<8x1xf32>
    %34 = arith.subf %33, %32 : vector<8x1xf32>
    %35 = math.exp %34 : vector<8x1xf32>
    %cst_24 = arith.constant 1.000000e+00 : f32
    %36 = vector.broadcast %cst_24 : f32 to vector<8x1xf32>
    %37 = arith.addf %36, %35 : vector<8x1xf32>
    %38 = tpu.reciprocal %37 {approx = true} : vector<8x1xf32> -> vector<8x1xf32>
    %c0_25 = arith.constant 0 : index
    %c0_26 = arith.constant 0 : index
    %39 = vector.load %arg10[%c0_25, %c0_26] : memref<8x1xf32, #tpu.memory_space<vmem>>, vector<8x1xf32>
    tpu.vector_store %arg10[%c0_25, %c0_26], %38 {strides = array<i32>} : memref<8x1xf32, #tpu.memory_space<vmem>>, vector<8x1xf32>,
    return
  }
  func.func @transform_0(%arg0: i32) -> (i32, i32) {
    %c0_i32 = arith.constant 0 : i32
    %c0_i32_0 = arith.constant 0 : i32
    return %arg0, %c0_i32 : i32, i32
  }
  func.func @transform_1(%arg0: i32) -> (i32, i32) {
    %c0_i32 = arith.constant 0 : i32
    %c0_i32_0 = arith.constant 0 : i32
    %c0_i32_1 = arith.constant 0 : i32
    return %c0_i32, %c0_i32_0 : i32, i32
  }
  func.func @transform_2(%arg0: i32) -> (i32, i32) {
    %c0_i32 = arith.constant 0 : i32
    %c0_i32_0 = arith.constant 0 : i32
    %c0_i32_1 = arith.constant 0 : i32
    return %c0_i32, %c0_i32_0 : i32, i32
  }
  func.func @transform_3(%arg0: i32) -> (i32, i32) {
    %c0_i32 = arith.constant 0 : i32
    %c0_i32_0 = arith.constant 0 : i32
    %c0_i32_1 = arith.constant 0 : i32
    return %c0_i32, %c0_i32_0 : i32, i32
  }
  func.func @transform_4(%arg0: i32) -> (i32, i32) {
    %c0_i32 = arith.constant 0 : i32
    %c0_i32_0 = arith.constant 0 : i32
    %c0_i32_1 = arith.constant 0 : i32
    return %c0_i32, %c0_i32_0 : i32, i32
  }
  func.func @transform_5(%arg0: i32) -> (i32, i32) {
    %c0_i32 = arith.constant 0 : i32
    %c0_i32_0 = arith.constant 0 : i32
    %c0_i32_1 = arith.constant 0 : i32
    return %c0_i32, %c0_i32_0 : i32, i32
  }
  func.func @transform_6(%arg0: i32) -> (i32, i32) {
    %c0_i32 = arith.constant 0 : i32
    %c0_i32_0 = arith.constant 0 : i32
    %c0_i32_1 = arith.constant 0 : i32
    return %c0_i32, %c0_i32_0 : i32, i32
  }
  func.func @transform_7(%arg0: i32) -> (i32, i32) {
    %c0_i32 = arith.constant 0 : i32
    %c0_i32_0 = arith.constant 0 : i32
    %c0_i32_1 = arith.constant 0 : i32
    return %c0_i32, %c0_i32_0 : i32, i32
  }
  func.func @transform_8(%arg0: i32) -> (i32, i32) {
    %c0_i32 = arith.constant 0 : i32
    %c0_i32_0 = arith.constant 0 : i32
    %c0_i32_1 = arith.constant 0 : i32
    return %c0_i32, %c0_i32_0 : i32, i32
  }
  func.func @transform_9(%arg0: i32) -> (i32, i32) {
    %c0_i32 = arith.constant 0 : i32
    %c0_i32_0 = arith.constant 0 : i32
    return %arg0, %c0_i32 : i32, i32
  }
}

</mosaic_0001>

<bundles_post_ra>
// kernel: tpu_custom_call.1
= control target key start
LH: loop header
LB: loop body
LE: loop exit
PB: predicated region body
PF: predicated region fallthrough
CT: control target
= control target key end

     0   :  { %s2582_s0 = inlined_call_operand.hbm [shape: bf16[8,512], index: 0, kind: input, shape index: {}]   ;;  %s2583_s1 = inlined_call_operand.hbm [shape: bf16[512,512], index: 1, kind: input, shape index: {}]   ;;  %s2584_s2 = inlined_call_operand.vmem [shape: f32[1,512], index: 2, kind: input, shape index: {}]   ;;  %s2585_s3 = inlined_call_operand.hbm [shape: bf16[512,256], index: 3, kind: input, shape index: {}]   ;;  %s2586_s4 = inlined_call_operand.vmem [shape: f32[1,256], index: 4, kind: input, shape index: {}]   ;;  %s2587_s5 = inlined_call_operand.hbm [shape: bf16[256,128], index: 5, kind: input, shape index: {}]   ;;  %s2588_s6 = inlined_call_operand.vmem [shape: f32[1,128], index: 6, kind: input, shape index: {}]   ;;  %s2589_s7 = inlined_call_operand.vmem [shape: bf16[1,128], index: 7, kind: input, shape index: {}]   ;;  %s2590_s8 = inlined_call_operand.<no memory space> [shape: f32[1,1], index: 8, kind: input, shape index: {}]   ;;  %s2591_s9 = inlined_call_operand.vmem [shape: f32[8,1], index: 9, kind: output, shape index: {}]  }
   0x1   :  { %v14_v0 = vstv %s2590_s8 }
   0x2   :  { %15 = vst [vmem:[#allocation2] sm:$0x1] %v14_v0 }
   0x3   :  { %16 = vsyncpa [#allocation4], 0 }
   0x4   :  { %17 = vsyncpa [#allocation6], 0 }
   0x5   :  { %18 = vsyncpa [#allocation9], 0  ;;  %s2423_s11 = smov [#allocation5]   ;;  %s2329_s15 = scalar_lea.hbm %s2583_s1, 16384 }
   0x6   :  { %s34_s12 = sshll.u32 %s2423_s11, 4  ;;  %p2330_p0 = scmp.ne.s32.totalorder %s2583_s1, %s2329_s15  ;;  %s35_s12 = int_to_ptr.vmem [resolvable:$true] %s34_s12 }
   0x7   :  { %p2333_p1 = scmp.lt.u32.totalorder %s2329_s15, %s2583_s1 }
   0x9   :  { %p2335_p2 = pnand %p2333_p1, %p2330_p0 }
   0xb   :  { %2338 = shalt.err (!%p2335_p2)
}
   0xc   :  { %s2339_s8 = scalar_lea.vmem %s35_s12, 16384  ;;  %p2344_p4 = scmp.lt.s32.totalorder %s35_s12, %s35_s12 }
   0xd   :  { %p2340_p3 = scmp.ne.s32.totalorder %s35_s12, %s2339_s8  ;;  %p2345_p5 = scmp.lt.s32.totalorder %s2339_s8, %s2339_s8 }
   0xf   :  { %p2346_p6 = por %p2345_p5, %p2344_p4 }
  0x11   :  { %p2347_p7 = pnand %p2346_p6, %p2340_p3 }
  0x13   :  { %2350 = shalt.err (!%p2347_p7)
}
  0x14   :  { %s2424_s20 = smov 256   ;;  %s2425_s21 = smov 16  }
  0x15   :  { %40 = dma.hbm_to_vmem [thread:$0]  %s2583_s1, 16384, %s35_s12, [#allocation6], %s2424_s20, %s2424_s20, %s2425_s21  }
  0x16   :  { %s2426_s24 = smov [#allocation3]   ;;  %s2427_s26 = smov [#allocation7]  }
  0x17   :  { %s25_s25 = sshll.u32 %s2426_s24, 4  ;;  %s48_s27 = sshll.u32 %s2427_s26, 4  ;;  %s26_s25 = int_to_ptr.vmem [resolvable:$true] %s25_s25  ;;  %s49_s27 = int_to_ptr.vmem [resolvable:$true] %s48_s27 }
  0x18   :  { %s2351_s30 = scalar_lea.hbm %s2582_s0, 256 }
  0x19   :  { %p2352_p8 = scmp.ne.s32.totalorder %s2582_s0, %s2351_s30  ;;  %p2355_p9 = scmp.lt.u32.totalorder %s2351_s30, %s2582_s0 }
  0x1b   :  { %p2357_p10 = pnand %p2355_p9, %p2352_p8 }
  0x1d   :  { %2360 = shalt.err (!%p2357_p10)
}
  0x1e   :  { %s2361_s1 = scalar_lea.vmem %s26_s25, 256  ;;  %p2366_p12 = scmp.lt.s32.totalorder %s26_s25, %s26_s25 }
  0x1f   :  { %p2362_p11 = scmp.ne.s32.totalorder %s26_s25, %s2361_s1  ;;  %p2367_p13 = scmp.lt.s32.totalorder %s2361_s1, %s2361_s1 }
  0x21   :  { %p2368_p0 = por %p2367_p13, %p2366_p12 }
  0x23   :  { %p2369_p1 = pnand %p2368_p0, %p2362_p11 }
  0x25   :  { %2372 = shalt.err (!%p2369_p1)
}
  0x26   :  { %28 = dma.hbm_to_vmem [thread:$0]  %s2582_s0, 256, %s26_s25, [#allocation4]  }
  0x27   :  { %s2373_s18 = scalar_lea.hbm %s2585_s3, 8192 }
  0x28   :  { %p2374_p2 = scmp.ne.s32.totalorder %s2585_s3, %s2373_s18  ;;  %p2377_p3 = scmp.lt.u32.totalorder %s2373_s18, %s2585_s3 }
  0x2a   :  { %p2379_p4 = pnand %p2377_p3, %p2374_p2 }
  0x2c   :  { %2382 = shalt.err (!%p2379_p4)
}
  0x2d   :  { %s2383_s22 = scalar_lea.vmem %s49_s27, 8192  ;;  %p2388_p6 = scmp.lt.s32.totalorder %s49_s27, %s49_s27 }
  0x2e   :  { %p2384_p5 = scmp.ne.s32.totalorder %s49_s27, %s2383_s22  ;;  %p2389_p7 = scmp.lt.s32.totalorder %s2383_s22, %s2383_s22 }
  0x30   :  { %p2390_p8 = por %p2389_p7, %p2388_p6 }
  0x32   :  { %p2391_p9 = pnand %p2390_p8, %p2384_p5 }
  0x34   :  { %2394 = shalt.err (!%p2391_p9)
}
  0x35   :  { %s2428_s0 = smov 128   ;;  %s2429_s23 = smov 8  }
  0x36   :  { %54 = dma.hbm_to_vmem [thread:$0]  %s2585_s3, 8192, %s49_s27, [#allocation6], %s2428_s0, %s2428_s0, %s2429_s23  }
  0x37   :  { %s2430_s26 = smov [#allocation8]   ;;  %s2395_s10 = scalar_lea.hbm %s2587_s5, 2048 }
  0x38   :  { %s62_s28 = sshll.u32 %s2430_s26, 4  ;;  %p2396_p10 = scmp.ne.s32.totalorder %s2587_s5, %s2395_s10  ;;  %s63_s28 = int_to_ptr.vmem [resolvable:$true] %s62_s28 }
  0x39   :  { %p2399_p11 = scmp.lt.u32.totalorder %s2395_s10, %s2587_s5 }
  0x3b   :  { %p2401_p12 = pnand %p2399_p11, %p2396_p10 }
  0x3d   :  { %2404 = shalt.err (!%p2401_p12)
}
  0x3e   :  { %s2405_s12 = scalar_lea.vmem %s63_s28, 2048  ;;  %p2410_p0 = scmp.lt.s32.totalorder %s63_s28, %s63_s28 }
  0x3f   :  { %p2406_p13 = scmp.ne.s32.totalorder %s63_s28, %s2405_s12  ;;  %p2411_p1 = scmp.lt.s32.totalorder %s2405_s12, %s2405_s12 }
  0x41   :  { %p2412_p2 = por %p2411_p1, %p2410_p0 }
  0x43   :  { %p2413_p3 = pnand %p2412_p2, %p2406_p13 }
  0x45   :  { %2416 = shalt.err (!%p2413_p3)
}
  0x46   :  { %s2431_s3 = smov 64   ;;  %s2432_s27 = smov 4  }
  0x47   :  { %68 = dma.hbm_to_vmem [thread:$0]  %s2587_s5, 2048, %s63_s28, [#allocation9], %s2431_s3, %s2431_s3, %s2432_s27  }
  0x48   :  { %2417 = dma.done.wait [#allocation4], 256  }
  0x49   :  { %2418 = vsyncadd [#allocation4], 4294967040 }
  0x4a   :  { %2419 = dma.done.wait [#allocation6], 24576  }
  0x4b   :  { %2420 = vsyncadd [#allocation6], 4294942720 }
  0x4c   :  { %2421 = dma.done.wait [#allocation9], 2048  }
  0x4d   :  { %2422 = vsyncadd [#allocation9], 4294965248  ;;  %v2017_v1 = vld [vmem:[#allocation5 + $0x4] ss:$16 sps:$4 sm:$0xff]   ;;  %v2019_v2 = vld [vmem:[#allocation5] ss:$16 sps:$4 sm:$0xff]  }
  0x4e   :  { %894 = vmatprep.subr.bf16.mxu1 %v2017_v1  ;;  %v2020_v3 = vld [vmem:[#allocation5 + $0x204] ss:$16 sps:$4 sm:$0xff]   ;;  %v2022_v4 = vld [vmem:[#allocation5 + $0x200] ss:$16 sps:$4 sm:$0xff]   ;;  %v89_v51 = vld [vmem:[#allocation3 + $0x8] sm:$0xff]  ;;  %vm1746_vm0 = vcmask 7168  }
  0x4f   :  { %895 = vmatpush1.bf16.msra.mxu1 %v2019_v2  ;;  %v2023_v5 = vld [vmem:[#allocation5 + $0x24] ss:$16 sps:$4 sm:$0xff]   ;;  %v2025_v6 = vld [vmem:[#allocation5 + $0x20] ss:$16 sps:$4 sm:$0xff]   ;;  %935 = vmatprep.subr.bf16.mxu0 %v2020_v3  ;;  %v2534_v53 = vcombine.high %v89_v51, %v89_v51 }
  0x50   :  { %v2026_v7 = vld [vmem:[#allocation5 + $0x224] ss:$16 sps:$4 sm:$0xff]   ;;  %936 = vmatpush1.bf16.msra.mxu0 %v2022_v4  ;;  %896 = vmatprep.subr.bf16.mxu1 %v2023_v5  ;;  %v2028_v8 = vld [vmem:[#allocation5 + $0x220] ss:$16 sps:$4 sm:$0xff]   ;;  %v2117_v4 = vld [vmem:[#allocation5 + $0xc] ss:$16 sps:$4 sm:$0xff]  }
  0x51   :  { %937 = vmatprep.subr.bf16.mxu0 %v2026_v7  ;;  %v2029_v9 = vld [vmem:[#allocation5 + $0x44] ss:$16 sps:$4 sm:$0xff]   ;;  %v2031_v10 = vld [vmem:[#allocation5 + $0x40] ss:$16 sps:$4 sm:$0xff]   ;;  %967 = vmatprep.mubr.bf16.mxu0 %v2534_v53  ;;  %v2115_v7 = vld [vmem:[#allocation5 + $0x8] ss:$16 sps:$4 sm:$0xff]  }
  0x52   :  { %v2032_v11 = vld [vmem:[#allocation5 + $0x244] ss:$16 sps:$4 sm:$0xff]   ;;  %v2034_v13 = vld [vmem:[#allocation5 + $0x240] ss:$16 sps:$4 sm:$0xff]  }
  0x53   :  { %897 = vmatpush1.bf16.msra.mxu1 %v2025_v6  ;;  %v2035_v12 = vld [vmem:[#allocation5 + $0x64] ss:$16 sps:$4 sm:$0xff]   ;;  %v2037_v15 = vld [vmem:[#allocation5 + $0x60] ss:$16 sps:$4 sm:$0xff]  }
  0x54   :  { %898 = vmatprep.subr.bf16.mxu1 %v2029_v9  ;;  %938 = vmatpush1.bf16.msra.mxu0 %v2028_v8  ;;  %v2038_v14 = vld [vmem:[#allocation5 + $0x264] ss:$16 sps:$4 sm:$0xff]   ;;  %v2040_v17 = vld [vmem:[#allocation5 + $0x260] ss:$16 sps:$4 sm:$0xff]   ;;  %v2539_v8 = vcombine.low %v89_v51, %v89_v51  ;;  %v2122_v9 = vld [vmem:[#allocation5 + $0x2c] ss:$16 sps:$4 sm:$0xff]  }
  0x55   :  { %939 = vmatprep.subr.bf16.mxu0 %v2032_v11  ;;  %v2041_v16 = vld [vmem:[#allocation5 + $0x84] ss:$16 sps:$4 sm:$0xff]   ;;  %v2043_v19 = vld [vmem:[#allocation5 + $0x80] ss:$16 sps:$4 sm:$0xff]   ;;  %v2125_v11 = vld [vmem:[#allocation5 + $0x4c] ss:$16 sps:$4 sm:$0xff]  }
  0x56   :  { %v2044_v18 = vld [vmem:[#allocation5 + $0x284] ss:$16 sps:$4 sm:$0xff]   ;;  %v2046_v21 = vld [vmem:[#allocation5 + $0x280] ss:$16 sps:$4 sm:$0xff]  }
  0x57   :  { %899 = vmatpush1.bf16.msra.mxu1 %v2031_v10  ;;  %v2047_v20 = vld [vmem:[#allocation5 + $0xa4] ss:$16 sps:$4 sm:$0xff]   ;;  %v2049_v23 = vld [vmem:[#allocation5 + $0xa0] ss:$16 sps:$4 sm:$0xff]   ;;  %v2120_v10 = vld [vmem:[#allocation5 + $0x28] ss:$16 sps:$4 sm:$0xff]  }
  0x58   :  { %900 = vmatprep.subr.bf16.mxu1 %v2035_v12  ;;  %940 = vmatpush1.bf16.msra.mxu0 %v2034_v13  ;;  %v2050_v22 = vld [vmem:[#allocation5 + $0x2a4] ss:$16 sps:$4 sm:$0xff]   ;;  %v2052_v25 = vld [vmem:[#allocation5 + $0x2a0] ss:$16 sps:$4 sm:$0xff]   ;;  %v2123_v12 = vld [vmem:[#allocation5 + $0x48] ss:$16 sps:$4 sm:$0xff]  }
  0x59   :  { %941 = vmatprep.subr.bf16.mxu0 %v2038_v14  ;;  %v2053_v24 = vld [vmem:[#allocation5 + $0xc4] ss:$16 sps:$4 sm:$0xff]   ;;  %v2055_v27 = vld [vmem:[#allocation5 + $0xc0] ss:$16 sps:$4 sm:$0xff]   ;;  %v2128_v13 = vld [vmem:[#allocation5 + $0x6c] ss:$16 sps:$4 sm:$0xff]  }
  0x5a   :  { %v2056_v26 = vld [vmem:[#allocation5 + $0x2c4] ss:$16 sps:$4 sm:$0xff]   ;;  %v2058_v29 = vld [vmem:[#allocation5 + $0x2c0] ss:$16 sps:$4 sm:$0xff]   ;;  %v2126_v14 = vld [vmem:[#allocation5 + $0x68] ss:$16 sps:$4 sm:$0xff]  }
  0x5b   :  { %901 = vmatpush1.bf16.msra.mxu1 %v2037_v15  ;;  %v2059_v28 = vld [vmem:[#allocation5 + $0xe4] ss:$16 sps:$4 sm:$0xff]   ;;  %v2061_v31 = vld [vmem:[#allocation5 + $0xe0] ss:$16 sps:$4 sm:$0xff]   ;;  %v2131_v15 = vld [vmem:[#allocation5 + $0x8c] ss:$16 sps:$4 sm:$0xff]  }
  0x5c   :  { %902 = vmatprep.subr.bf16.mxu1 %v2041_v16  ;;  %942 = vmatpush1.bf16.msra.mxu0 %v2040_v17  ;;  %v2062_v30 = vld [vmem:[#allocation5 + $0x2e4] ss:$16 sps:$4 sm:$0xff]   ;;  %v2064_v33 = vld [vmem:[#allocation5 + $0x2e0] ss:$16 sps:$4 sm:$0xff]   ;;  %v2129_v16 = vld [vmem:[#allocation5 + $0x88] ss:$16 sps:$4 sm:$0xff]  }
  0x5d   :  { %943 = vmatprep.subr.bf16.mxu0 %v2044_v18  ;;  %v2065_v32 = vld [vmem:[#allocation5 + $0x104] ss:$16 sps:$4 sm:$0xff]   ;;  %v2067_v35 = vld [vmem:[#allocation5 + $0x100] ss:$16 sps:$4 sm:$0xff]   ;;  %v2134_v17 = vld [vmem:[#allocation5 + $0xac] ss:$16 sps:$4 sm:$0xff]  }
  0x5e   :  { %v2068_v34 = vld [vmem:[#allocation5 + $0x304] ss:$16 sps:$4 sm:$0xff]   ;;  %v2070_v37 = vld [vmem:[#allocation5 + $0x300] ss:$16 sps:$4 sm:$0xff]   ;;  %v2132_v18 = vld [vmem:[#allocation5 + $0xa8] ss:$16 sps:$4 sm:$0xff]  }
  0x5f   :  { %903 = vmatpush1.bf16.msra.mxu1 %v2043_v19  ;;  %v2071_v36 = vld [vmem:[#allocation5 + $0x124] ss:$16 sps:$4 sm:$0xff]   ;;  %v2073_v39 = vld [vmem:[#allocation5 + $0x120] ss:$16 sps:$4 sm:$0xff]   ;;  %v2137_v19 = vld [vmem:[#allocation5 + $0xcc] ss:$16 sps:$4 sm:$0xff]  }
  0x60   :  { %904 = vmatprep.subr.bf16.mxu1 %v2047_v20  ;;  %944 = vmatpush1.bf16.msra.mxu0 %v2046_v21  ;;  %v2074_v38 = vld [vmem:[#allocation5 + $0x324] ss:$16 sps:$4 sm:$0xff]   ;;  %v2076_v41 = vld [vmem:[#allocation5 + $0x320] ss:$16 sps:$4 sm:$0xff]   ;;  %v2135_v20 = vld [vmem:[#allocation5 + $0xc8] ss:$16 sps:$4 sm:$0xff]  }
  0x61   :  { %945 = vmatprep.subr.bf16.mxu0 %v2050_v22  ;;  %v2077_v40 = vld [vmem:[#allocation5 + $0x144] ss:$16 sps:$4 sm:$0xff]   ;;  %v2079_v43 = vld [vmem:[#allocation5 + $0x140] ss:$16 sps:$4 sm:$0xff]  }
  0x62   :  { %v2080_v42 = vld [vmem:[#allocation5 + $0x344] ss:$16 sps:$4 sm:$0xff]   ;;  %v2082_v45 = vld [vmem:[#allocation5 + $0x340] ss:$16 sps:$4 sm:$0xff]  }
  0x63   :  { %905 = vmatpush1.bf16.msra.mxu1 %v2049_v23  ;;  %v2083_v44 = vld [vmem:[#allocation5 + $0x164] ss:$16 sps:$4 sm:$0xff]   ;;  %v2085_v48 = vld [vmem:[#allocation5 + $0x160] ss:$16 sps:$4 sm:$0xff]   ;;  %v2140_v23 = vld [vmem:[#allocation5 + $0xec] ss:$16 sps:$4 sm:$0xff]  }
  0x64   :  { %906 = vmatprep.subr.bf16.mxu1 %v2053_v24  ;;  %946 = vmatpush1.bf16.msra.mxu0 %v2052_v25  ;;  %v2086_v46 = vld [vmem:[#allocation5 + $0x364] ss:$16 sps:$4 sm:$0xff]   ;;  %v2088_v52 = vld [vmem:[#allocation5 + $0x360] ss:$16 sps:$4 sm:$0xff]   ;;  %v2138_v25 = vld [vmem:[#allocation5 + $0xe8] ss:$16 sps:$4 sm:$0xff]  }
  0x65   :  { %947 = vmatprep.subr.bf16.mxu0 %v2056_v26  ;;  %v88_v47 = vld [vmem:[#allocation3] sm:$0xff]  ;;  %v2213_v21 = vld [vmem:[#allocation7] ss:$8 sps:$4 sm:$0xff]   ;;  %v2215_v22 = vld [vmem:[#allocation7 + $0x4] ss:$8 sps:$4 sm:$0xff]  }
  0x66   :  { %v1756_v49 = vcombine.high %v88_v47, %v88_v47  ;;  %v2089_v50 = vld [vmem:[#allocation5 + $0x184] ss:$16 sps:$4 sm:$0xff]   ;;  %v2091_v55 = vld [vmem:[#allocation5 + $0x180] ss:$16 sps:$4 sm:$0xff]   ;;  %v2537_v6 = vcombine.low %v88_v47, %v88_v47 }
  0x67   :  { %907 = vmatpush1.bf16.msra.mxu1 %v2055_v27  ;;  %v2092_v54 = vld [vmem:[#allocation5 + $0x384] ss:$16 sps:$4 sm:$0xff]   ;;  %v2094_v57 = vld [vmem:[#allocation5 + $0x380] ss:$16 sps:$4 sm:$0xff]  }
  0x68   :  { %908 = vmatprep.subr.bf16.mxu1 %v2059_v28  ;;  %948 = vmatpush1.bf16.msra.mxu0 %v2058_v29  ;;  %v2095_v56 = vld [vmem:[#allocation5 + $0x1a4] ss:$16 sps:$4 sm:$0xff]   ;;  %v2097_v59 = vld [vmem:[#allocation5 + $0x1a0] ss:$16 sps:$4 sm:$0xff]   ;;  %v2143_v28 = vld [vmem:[#allocation5 + $0x10c] ss:$16 sps:$4 sm:$0xff]  }
  0x69   :  { %949 = vmatprep.subr.bf16.mxu0 %v2062_v30  ;;  %926 = vmatprep.mubr.bf16.mxu1 %v1756_v49  ;;  %v2098_v58 = vld [vmem:[#allocation5 + $0x3a4] ss:$16 sps:$4 sm:$0xff]   ;;  %v2100_v61 = vld [vmem:[#allocation5 + $0x3a0] ss:$16 sps:$4 sm:$0xff]   ;;  %v2141_v29 = vld [vmem:[#allocation5 + $0x108] ss:$16 sps:$4 sm:$0xff]  }
  0x6a   :  { %v2101_v60 = vld [vmem:[#allocation5 + $0x1c4] ss:$16 sps:$4 sm:$0xff]   ;;  %v2103_v63 = vld [vmem:[#allocation5 + $0x1c0] ss:$16 sps:$4 sm:$0xff]  }
  0x6b   :  { %909 = vmatpush1.bf16.msra.mxu1 %v2061_v31  ;;  %v2104_v62 = vld [vmem:[#allocation5 + $0x3c4] ss:$16 sps:$4 sm:$0xff]   ;;  %v2106_v1 = vld [vmem:[#allocation5 + $0x3c0] ss:$16 sps:$4 sm:$0xff]  }
  0x6c   :  { %910 = vmatprep.subr.bf16.mxu1 %v2065_v32  ;;  %950 = vmatpush1.bf16.msra.mxu0 %v2064_v33  ;;  %v2107_v0 = vld [vmem:[#allocation5 + $0x1e4] ss:$16 sps:$4 sm:$0xff]   ;;  %v2109_v3 = vld [vmem:[#allocation5 + $0x1e0] ss:$16 sps:$4 sm:$0xff]   ;;  %v2146_v32 = vld [vmem:[#allocation5 + $0x12c] ss:$16 sps:$4 sm:$0xff]  }
  0x6d   :  { %951 = vmatprep.subr.bf16.mxu0 %v2068_v34  ;;  %v2110_v2 = vld [vmem:[#allocation5 + $0x3e4] ss:$16 sps:$4 sm:$0xff]   ;;  %v2114_v5 = vld [vmem:[#allocation5 + $0x3e0] ss:$16 sps:$4 sm:$0xff]   ;;  %v2144_v33 = vld [vmem:[#allocation5 + $0x128] ss:$16 sps:$4 sm:$0xff]  }
  0x6e   :  { %v2218_v24 = vld [vmem:[#allocation7 + $0x14] ss:$8 sps:$4 sm:$0xff]   ;;  %v2216_v26 = vld [vmem:[#allocation7 + $0x10] ss:$8 sps:$4 sm:$0xff]   ;;  %v2221_v27 = vld [vmem:[#allocation7 + $0x24] ss:$8 sps:$4 sm:$0xff]  }
  0x6f   :  { %911 = vmatpush1.bf16.msra.mxu1 %v2067_v35  ;;  %v2219_v30 = vld [vmem:[#allocation7 + $0x20] ss:$8 sps:$4 sm:$0xff]   ;;  %v2224_v31 = vld [vmem:[#allocation7 + $0x34] ss:$8 sps:$4 sm:$0xff]   ;;  %v2222_v34 = vld [vmem:[#allocation7 + $0x30] ss:$8 sps:$4 sm:$0xff]  }
  0x70   :  { %912 = vmatprep.subr.bf16.mxu1 %v2071_v36  ;;  %952 = vmatpush1.bf16.msra.mxu0 %v2070_v37  ;;  %v2227_v35 = vld [vmem:[#allocation7 + $0x44] ss:$8 sps:$4 sm:$0xff]   ;;  %v2147_v37 = vld [vmem:[#allocation5 + $0x148] ss:$16 sps:$4 sm:$0xff]   ;;  %v2236_v47 = vld [vmem:[#allocation7 + $0x74] ss:$8 sps:$4 sm:$0xff]  }
  0x71   :  { %953 = vmatprep.subr.bf16.mxu0 %v2074_v38  ;;  %v2149_v36 = vld [vmem:[#allocation5 + $0x14c] ss:$16 sps:$4 sm:$0xff]   ;;  %v2225_v38 = vld [vmem:[#allocation7 + $0x40] ss:$8 sps:$4 sm:$0xff]  }
  0x72   :  { %v2239_v51 = vld [vmem:[#allocation7 + $0x84] ss:$8 sps:$4 sm:$0xff]  }
  0x73   :  { %913 = vmatpush1.bf16.msra.mxu1 %v2073_v39  ;;  %v2230_v39 = vld [vmem:[#allocation7 + $0x54] ss:$8 sps:$4 sm:$0xff]  }
  0x74   :  { %914 = vmatprep.subr.bf16.mxu1 %v2077_v40  ;;  %954 = vmatpush1.bf16.msra.mxu0 %v2076_v41  ;;  %v2152_v40 = vld [vmem:[#allocation5 + $0x16c] ss:$16 sps:$4 sm:$0xff]   ;;  %v2228_v41 = vld [vmem:[#allocation7 + $0x50] ss:$8 sps:$4 sm:$0xff]  }
  0x75   :  { %955 = vmatprep.subr.bf16.mxu0 %v2080_v42  ;;  %v2150_v42 = vld [vmem:[#allocation5 + $0x168] ss:$16 sps:$4 sm:$0xff]  }
  0x77   :  { %915 = vmatpush1.bf16.msra.mxu1 %v2079_v43  ;;  %v2233_v43 = vld [vmem:[#allocation7 + $0x64] ss:$8 sps:$4 sm:$0xff]  }
  0x78   :  { %916 = vmatprep.subr.bf16.mxu1 %v2083_v44  ;;  %956 = vmatpush1.bf16.msra.mxu0 %v2082_v45  ;;  %v2155_v44 = vld [vmem:[#allocation5 + $0x18c] ss:$16 sps:$4 sm:$0xff]   ;;  %v2231_v45 = vld [vmem:[#allocation7 + $0x60] ss:$8 sps:$4 sm:$0xff]  }
  0x79   :  { %957 = vmatprep.subr.bf16.mxu0 %v2086_v46  ;;  %v2153_v46 = vld [vmem:[#allocation5 + $0x188] ss:$16 sps:$4 sm:$0xff]  }
  0x7b   :  { %917 = vmatpush1.bf16.msra.mxu1 %v2085_v48  ;;  %v2158_v48 = vld [vmem:[#allocation5 + $0x1ac] ss:$16 sps:$4 sm:$0xff]  }
  0x7c   :  { %918 = vmatprep.subr.bf16.mxu1 %v2089_v50  ;;  %958 = vmatpush1.bf16.msra.mxu0 %v2088_v52  ;;  %v2156_v50 = vld [vmem:[#allocation5 + $0x1a8] ss:$16 sps:$4 sm:$0xff]   ;;  %v2161_v52 = vld [vmem:[#allocation5 + $0x1cc] ss:$16 sps:$4 sm:$0xff]  }
  0x7d   :  { %959 = vmatprep.subr.bf16.mxu0 %v2092_v54  ;;  %v2237_v54 = vld [vmem:[#allocation7 + $0x80] ss:$8 sps:$4 sm:$0xff]  }
  0x7f   :  { %919 = vmatpush1.bf16.msra.mxu1 %v2091_v55  ;;  %v2159_v55 = vld [vmem:[#allocation5 + $0x1c8] ss:$16 sps:$4 sm:$0xff]  }
  0x80   :  { %920 = vmatprep.subr.bf16.mxu1 %v2095_v56  ;;  %960 = vmatpush1.bf16.msra.mxu0 %v2094_v57  ;;  %v2242_v56 = vld [vmem:[#allocation7 + $0x94] ss:$8 sps:$4 sm:$0xff]  }
  0x81   :  { %961 = vmatprep.subr.bf16.mxu0 %v2098_v58  ;;  %v2164_v57 = vld [vmem:[#allocation5 + $0x1ec] ss:$16 sps:$4 sm:$0xff]   ;;  %v2240_v58 = vld [vmem:[#allocation7 + $0x90] ss:$8 sps:$4 sm:$0xff]  }
  0x83   :  { %921 = vmatpush1.bf16.msra.mxu1 %v2097_v59  ;;  %v2162_v59 = vld [vmem:[#allocation5 + $0x1e8] ss:$16 sps:$4 sm:$0xff]  }
  0x84   :  { %922 = vmatprep.subr.bf16.mxu1 %v2101_v60  ;;  %962 = vmatpush1.bf16.msra.mxu0 %v2100_v61  ;;  %v2245_v60 = vld [vmem:[#allocation7 + $0xa4] ss:$8 sps:$4 sm:$0xff]  }
  0x85   :  { %963 = vmatprep.subr.bf16.mxu0 %v2104_v62  ;;  %v2167_v61 = vld [vmem:[#allocation5 + $0x20c] ss:$16 sps:$4 sm:$0xff]   ;;  %v2243_v62 = vld [vmem:[#allocation7 + $0xa0] ss:$8 sps:$4 sm:$0xff]  }
  0x87   :  { %923 = vmatpush1.bf16.msra.mxu1 %v2103_v63  ;;  %v2165_v63 = vld [vmem:[#allocation5 + $0x208] ss:$16 sps:$4 sm:$0xff]  }
  0x88   :  { %924 = vmatprep.subr.bf16.mxu1 %v2107_v0  ;;  %964 = vmatpush1.bf16.msra.mxu0 %v2106_v1  ;;  %v2170_v0 = vld [vmem:[#allocation5 + $0x22c] ss:$16 sps:$4 sm:$0xff]  }
  0x89   :  { %965 = vmatprep.subr.bf16.mxu0 %v2110_v2  ;;  %v2248_v1 = vld [vmem:[#allocation7 + $0xb4] ss:$8 sps:$4 sm:$0xff]   ;;  %v2246_v2 = vld [vmem:[#allocation7 + $0xb0] ss:$8 sps:$4 sm:$0xff]  }
  0x8b   :  { %925 = vmatpush1.bf16.msra.mxu1 %v2109_v3  ;;  %v2168_v3 = vld [vmem:[#allocation5 + $0x228] ss:$16 sps:$4 sm:$0xff]  }
  0x8c   :  { %976 = vmatprep.subr.bf16.mxu1 %v2117_v4  ;;  %966 = vmatpush1.bf16.msra.mxu0 %v2114_v5  ;;  %v2251_v4 = vld [vmem:[#allocation7 + $0xc4] ss:$8 sps:$4 sm:$0xff]  }
  0x8d   :  { %1462 = vmatprep.subr.bf16.mxu0 %v2215_v22  ;;  %v2173_v5 = vld [vmem:[#allocation5 + $0x24c] ss:$16 sps:$4 sm:$0xff]   ;;  %v2186_v22 = vld [vmem:[#allocation5 + $0x2e8] ss:$16 sps:$4 sm:$0xff]  }
  0x8e   :  { %927 = vmatmul.mubr.bf16.vlgmr.msra.gmra.mrb[0].mxu1 %v2537_v6 }
  0x8f   :  { %977 = vmatpush1.bf16.msra.mxu1 %v2115_v7  ;;  %1008 = vmatprep.mubr.bf16.mxu1 %v1756_v49  ;;  %v2234_v49 = vld [vmem:[#allocation7 + $0x70] ss:$8 sps:$4 sm:$0xff]   ;;  %v2249_v7 = vld [vmem:[#allocation7 + $0xc0] ss:$8 sps:$4 sm:$0xff]  }
  0x90   :  { %968 = vmatmul.mubr.bf16.vlgmr.msra.gmra.mrb[0].mxu0 %v2539_v8  ;;  %978 = vmatprep.subr.bf16.mxu1 %v2122_v9  ;;  %v2171_v9 = vld [vmem:[#allocation5 + $0x248] ss:$16 sps:$4 sm:$0xff]  }
  0x91   :  { %1463 = vmatpush1.bf16.msra.mxu0 %v2213_v21  ;;  %v2260_v21 = vld [vmem:[#allocation7 + $0xf4] ss:$8 sps:$4 sm:$0xff]  }
  0x92   :  { %1464 = vmatprep.subr.bf16.mxu0 %v2218_v24  ;;  %v2191_v24 = vld [vmem:[#allocation5 + $0x30c] ss:$16 sps:$4 sm:$0xff]  }
  0x93   :  { %979 = vmatpush1.bf16.msra.mxu1 %v2120_v10  ;;  %v2254_v10 = vld [vmem:[#allocation7 + $0xd4] ss:$8 sps:$4 sm:$0xff]  }
  0x94   :  { %980 = vmatprep.subr.bf16.mxu1 %v2125_v11  ;;  %v2176_v11 = vld [vmem:[#allocation5 + $0x26c] ss:$16 sps:$4 sm:$0xff]  }
  0x95   :  { %1465 = vmatpush1.bf16.msra.mxu0 %v2216_v26  ;;  %v2194_v26 = vld [vmem:[#allocation5 + $0x32c] ss:$16 sps:$4 sm:$0xff]  }
  0x96   :  { %1466 = vmatprep.subr.bf16.mxu0 %v2221_v27  ;;  %v2263_v27 = vld [vmem:[#allocation7 + $0x104] ss:$8 sps:$4 sm:$0xff]  }
  0x97   :  { %981 = vmatpush1.bf16.msra.mxu1 %v2123_v12  ;;  %v2174_v12 = vld [vmem:[#allocation5 + $0x268] ss:$16 sps:$4 sm:$0xff]  }
  0x98   :  { %982 = vmatprep.subr.bf16.mxu1 %v2128_v13  ;;  %v2179_v13 = vld [vmem:[#allocation5 + $0x28c] ss:$16 sps:$4 sm:$0xff]  }
  0x99   :  { %1467 = vmatpush1.bf16.msra.mxu0 %v2219_v30  ;;  %v2195_v30 = vld [vmem:[#allocation5 + $0x348] ss:$16 sps:$4 sm:$0xff]  }
  0x9a   :  { %1468 = vmatprep.subr.bf16.mxu0 %v2224_v31  ;;  %v2200_v31 = vld [vmem:[#allocation5 + $0x36c] ss:$16 sps:$4 sm:$0xff]  }
  0x9b   :  { %983 = vmatpush1.bf16.msra.mxu1 %v2126_v14  ;;  %v2182_v14 = vld [vmem:[#allocation5 + $0x2ac] ss:$16 sps:$4 sm:$0xff]  }
  0x9c   :  { %984 = vmatprep.subr.bf16.mxu1 %v2131_v15  ;;  %v2180_v15 = vld [vmem:[#allocation5 + $0x2a8] ss:$16 sps:$4 sm:$0xff]  }
  0x9d   :  { %1469 = vmatpush1.bf16.msra.mxu0 %v2222_v34  ;;  %v2201_v34 = vld [vmem:[#allocation5 + $0x388] ss:$16 sps:$4 sm:$0xff]  }
  0x9e   :  { %1470 = vmatprep.subr.bf16.mxu0 %v2227_v35  ;;  %v2206_v35 = vld [vmem:[#allocation5 + $0x3ac] ss:$16 sps:$4 sm:$0xff]  }
  0x9f   :  { %985 = vmatpush1.bf16.msra.mxu1 %v2129_v16  ;;  %v2185_v16 = vld [vmem:[#allocation5 + $0x2cc] ss:$16 sps:$4 sm:$0xff]  }
  0xa0   :  { %986 = vmatprep.subr.bf16.mxu1 %v2134_v17  ;;  %v2257_v17 = vld [vmem:[#allocation7 + $0xe4] ss:$8 sps:$4 sm:$0xff]  }
  0xa1   :  { %1471 = vmatpush1.bf16.msra.mxu0 %v2225_v38  ;;  %v2207_v38 = vld [vmem:[#allocation5 + $0x3c8] ss:$16 sps:$4 sm:$0xff]  }
  0xa2   :  { %1472 = vmatprep.subr.bf16.mxu0 %v2230_v39  ;;  %v2212_v39 = vld [vmem:[#allocation5 + $0x3ec] ss:$16 sps:$4 sm:$0xff]  }
  0xa3   :  { %987 = vmatpush1.bf16.msra.mxu1 %v2132_v18  ;;  %v2183_v18 = vld [vmem:[#allocation5 + $0x2c8] ss:$16 sps:$4 sm:$0xff]  }
  0xa4   :  { %988 = vmatprep.subr.bf16.mxu1 %v2137_v19  ;;  %v2255_v19 = vld [vmem:[#allocation7 + $0xe0] ss:$8 sps:$4 sm:$0xff]  }
  0xa5   :  { %1473 = vmatpush1.bf16.msra.mxu0 %v2228_v41  ;;  %v220_v41 = vlaneseq }
  0xa6   :  { %1474 = vmatprep.subr.bf16.mxu0 %v2233_v43 }
  0xa7   :  { %989 = vmatpush1.bf16.msra.mxu1 %v2135_v20  ;;  %v2188_v20 = vld [vmem:[#allocation5 + $0x2ec] ss:$16 sps:$4 sm:$0xff]  }
  0xa8   :  { %990 = vmatprep.subr.bf16.mxu1 %v2140_v23  ;;  %v2258_v23 = vld [vmem:[#allocation7 + $0xf0] ss:$8 sps:$4 sm:$0xff]  }
  0xa9   :  { %1475 = vmatpush1.bf16.msra.mxu0 %v2231_v45 }
  0xaa   :  { %1476 = vmatprep.subr.bf16.mxu0 %v2236_v47 }
  0xab   :  { %991 = vmatpush1.bf16.msra.mxu1 %v2138_v25  ;;  %v2189_v25 = vld [vmem:[#allocation5 + $0x308] ss:$16 sps:$4 sm:$0xff]  }
  0xac   :  { %992 = vmatprep.subr.bf16.mxu1 %v2143_v28  ;;  %v2192_v28 = vld [vmem:[#allocation5 + $0x328] ss:$16 sps:$4 sm:$0xff]  }
  0xad   :  { %1477 = vmatpush1.bf16.msra.mxu0 %v2234_v49 }
  0xae   :  { %1478 = vmatprep.subr.bf16.mxu0 %v2239_v51 }
  0xaf   :  { %993 = vmatpush1.bf16.msra.mxu1 %v2141_v29  ;;  %v2197_v29 = vld [vmem:[#allocation5 + $0x34c] ss:$16 sps:$4 sm:$0xff]  }
  0xb0   :  { %994 = vmatprep.subr.bf16.mxu1 %v2146_v32  ;;  %v2198_v32 = vld [vmem:[#allocation5 + $0x368] ss:$16 sps:$4 sm:$0xff]  }
  0xb1   :  { %1479 = vmatpush1.bf16.msra.mxu0 %v2237_v54 }
  0xb2   :  { %1480 = vmatprep.subr.bf16.mxu0 %v2242_v56 }
  0xb3   :  { %995 = vmatpush1.bf16.msra.mxu1 %v2144_v33  ;;  %v2203_v33 = vld [vmem:[#allocation5 + $0x38c] ss:$16 sps:$4 sm:$0xff]  }
  0xb4   :  { %996 = vmatprep.subr.bf16.mxu1 %v2149_v36  ;;  %v2204_v36 = vld [vmem:[#allocation5 + $0x3a8] ss:$16 sps:$4 sm:$0xff]  }
  0xb5   :  { %1481 = vmatpush1.bf16.msra.mxu0 %v2240_v58 }
  0xb6   :  { %1482 = vmatprep.subr.bf16.mxu0 %v2245_v60 }
  0xb7   :  { %997 = vmatpush1.bf16.msra.mxu1 %v2147_v37  ;;  %v2209_v37 = vld [vmem:[#allocation5 + $0x3cc] ss:$16 sps:$4 sm:$0xff]  }
  0xb8   :  { %998 = vmatprep.subr.bf16.mxu1 %v2152_v40  ;;  %v2210_v40 = vld [vmem:[#allocation5 + $0x3e8] ss:$16 sps:$4 sm:$0xff]  }
  0xb9   :  { %1483 = vmatpush1.bf16.msra.mxu0 %v2243_v62 }
  0xba   :  { %1484 = vmatprep.subr.bf16.mxu0 %v2248_v1  ;;  %v2266_v1 = vld [vmem:[#allocation7 + $0x114] ss:$8 sps:$4 sm:$0xff]  }
  0xbb   :  { %999 = vmatpush1.bf16.msra.mxu1 %v2150_v42  ;;  %v2546_v42 = vshrl.u32 %v220_v41, 7  ;;  %v2308_v41 = vld [vmem:[#allocation7 + $0x1f4] ss:$8 sps:$4 sm:$0xff]  }
  0xbc   :  { %1000 = vmatprep.subr.bf16.mxu1 %v2155_v44  ;;  %v2554_v44 = vld [vmem:[%s2584_s2] sm:$0xf] }
  0xbd   :  { %1485 = vmatpush1.bf16.msra.mxu0 %v2246_v2  ;;  %v2549_v43 = vsub.s32 0, %v2546_v42  ;;  %v226_v45 = vsub.s32 1, %v2546_v42  ;;  %v2309_v2 = vld [vmem:[#allocation8 + $0x40] sm:$0xff]  }
  0xbe   :  { %1486 = vmatprep.subr.bf16.mxu0 %v2251_v4  ;;  %v2311_v4 = vld [vmem:[#allocation8 + $0x48] sm:$0xff]  }
  0xbf   :  { %1001 = vmatpush1.bf16.msra.mxu1 %v2153_v46  ;;  %v223_v46 = vrot.slane %v2554_v44, %v2549_v43 }
  0xc0   :  { %1002 = vmatprep.subr.bf16.mxu1 %v2158_v48 }
  0xc1   :  { %1487 = vmatpush1.bf16.msra.mxu0 %v2249_v7  ;;  %v2312_v7 = vld [vmem:[#allocation8 + $0x8] sm:$0xff]  }
  0xc2   :  { %1488 = vmatprep.subr.bf16.mxu0 %v2254_v10  ;;  %v2313_v10 = vld [vmem:[#allocation8 + $0x50] sm:$0xff]  }
  0xc3   :  { %1003 = vmatpush1.bf16.msra.mxu1 %v2156_v50 }
  0xc4   :  { %1004 = vmatprep.subr.bf16.mxu1 %v2161_v52 }
  0xc7   :  { %1005 = vmatpush1.bf16.msra.mxu1 %v2159_v55 }
  0xc8   :  { %1006 = vmatprep.subr.bf16.mxu1 %v2164_v57 }
  0xcb   :  { %1007 = vmatpush1.bf16.msra.mxu1 %v2162_v59 }
  0xcc   :  { %1017 = vmatprep.subr.bf16.mxu1 %v2167_v61 }
  0xce   :  { %1009 = vmatmul.mubr.bf16.vlgmr.msra.gmra.mrb[4].mxu1 %v2537_v6  ;;  %v2252_v6 = vld [vmem:[#allocation7 + $0xd0] ss:$8 sps:$4 sm:$0xff]  }
  0xcf   :  { %1018 = vmatpush1.bf16.msra.mxu1 %v2165_v63  ;;  %1049 = vmatprep.mubr.bf16.mxu1 %v2534_v53  ;;  %v2177_v53 = vld [vmem:[#allocation5 + $0x288] ss:$16 sps:$4 sm:$0xff]  }
  0xd0   :  { %1019 = vmatprep.subr.bf16.mxu1 %v2170_v0  ;;  %1489 = vmatpush1.bf16.msra.mxu0 %v2252_v6  ;;  %v2261_v0 = vld [vmem:[#allocation7 + $0x100] ss:$8 sps:$4 sm:$0xff]   ;;  %v2314_v6 = vld [vmem:[#allocation8 + $0x10] sm:$0xff]  }
  0xd1   :  { %1490 = vmatprep.subr.bf16.mxu0 %v2257_v17  ;;  %v2273_v17 = vld [vmem:[#allocation7 + $0x140] ss:$8 sps:$4 sm:$0xff]  }
  0xd3   :  { %1020 = vmatpush1.bf16.msra.mxu1 %v2168_v3  ;;  %v2310_v3 = vld [vmem:[#allocation8] sm:$0xff]  }
  0xd4   :  { %1021 = vmatprep.subr.bf16.mxu1 %v2173_v5  ;;  %1491 = vmatpush1.bf16.msra.mxu0 %v2255_v19  ;;  %v2264_v5 = vld [vmem:[#allocation7 + $0x110] ss:$8 sps:$4 sm:$0xff]   ;;  %v2278_v19 = vld [vmem:[#allocation7 + $0x154] ss:$8 sps:$4 sm:$0xff]  }
  0xd5   :  { %1492 = vmatprep.subr.bf16.mxu0 %v2260_v21  ;;  %v2276_v21 = vld [vmem:[#allocation7 + $0x150] ss:$8 sps:$4 sm:$0xff]  }
  0xd7   :  { %1022 = vmatpush1.bf16.msra.mxu1 %v2171_v9  ;;  %v2269_v9 = vld [vmem:[#allocation7 + $0x124] ss:$8 sps:$4 sm:$0xff]  }
  0xd8   :  { %1023 = vmatprep.subr.bf16.mxu1 %v2176_v11  ;;  %1493 = vmatpush1.bf16.msra.mxu0 %v2258_v23  ;;  %v2267_v11 = vld [vmem:[#allocation7 + $0x120] ss:$8 sps:$4 sm:$0xff]   ;;  %v2281_v23 = vld [vmem:[#allocation7 + $0x164] ss:$8 sps:$4 sm:$0xff]  }
  0xd9   :  { %1503 = vmatprep.subr.bf16.mxu0 %v2263_v27  ;;  %v2287_v27 = vld [vmem:[#allocation7 + $0x184] ss:$8 sps:$4 sm:$0xff]  }
  0xdb   :  { %1024 = vmatpush1.bf16.msra.mxu1 %v2174_v12  ;;  %v2272_v12 = vld [vmem:[#allocation7 + $0x134] ss:$8 sps:$4 sm:$0xff]  }
  0xdc   :  { %1025 = vmatprep.subr.bf16.mxu1 %v2179_v13  ;;  %v2315_v13 = vld [vmem:[#allocation8 + $0x58] sm:$0xff]  }
  0xdf   :  { %1026 = vmatpush1.bf16.msra.mxu1 %v2177_v53  ;;  %v2270_v53 = vld [vmem:[#allocation7 + $0x130] ss:$8 sps:$4 sm:$0xff]  }
  0xe0   :  { %1027 = vmatprep.subr.bf16.mxu1 %v2182_v14  ;;  %v2316_v14 = vld [vmem:[#allocation8 + $0x18] sm:$0xff]  }
  0xe3   :  { %1028 = vmatpush1.bf16.msra.mxu1 %v2180_v15  ;;  %v2275_v15 = vld [vmem:[#allocation7 + $0x144] ss:$8 sps:$4 sm:$0xff]  }
  0xe4   :  { %1029 = vmatprep.subr.bf16.mxu1 %v2185_v16  ;;  %v2317_v16 = vld [vmem:[#allocation8 + $0x60] sm:$0xff]  }
  0xe7   :  { %1030 = vmatpush1.bf16.msra.mxu1 %v2183_v18  ;;  %v2318_v18 = vld [vmem:[#allocation8 + $0x20] sm:$0xff]  }
  0xe8   :  { %1031 = vmatprep.subr.bf16.mxu1 %v2188_v20  ;;  %v2319_v20 = vld [vmem:[#allocation8 + $0x68] sm:$0xff]  }
  0xeb   :  { %1032 = vmatpush1.bf16.msra.mxu1 %v2186_v22  ;;  %v2320_v22 = vld [vmem:[#allocation8 + $0x28] sm:$0xff]  }
  0xec   :  { %1033 = vmatprep.subr.bf16.mxu1 %v2191_v24  ;;  %v2279_v24 = vld [vmem:[#allocation7 + $0x160] ss:$8 sps:$4 sm:$0xff]  }
  0xef   :  { %1034 = vmatpush1.bf16.msra.mxu1 %v2189_v25  ;;  %v2284_v25 = vld [vmem:[#allocation7 + $0x174] ss:$8 sps:$4 sm:$0xff]  }
  0xf0   :  { %1035 = vmatprep.subr.bf16.mxu1 %v2194_v26  ;;  %v2282_v26 = vld [vmem:[#allocation7 + $0x170] ss:$8 sps:$4 sm:$0xff]  }
  0xf3   :  { %1036 = vmatpush1.bf16.msra.mxu1 %v2192_v28  ;;  %v2285_v28 = vld [vmem:[#allocation7 + $0x180] ss:$8 sps:$4 sm:$0xff]  }
  0xf4   :  { %1037 = vmatprep.subr.bf16.mxu1 %v2197_v29  ;;  %v2290_v29 = vld [vmem:[#allocation7 + $0x194] ss:$8 sps:$4 sm:$0xff]  }
  0xf7   :  { %1038 = vmatpush1.bf16.msra.mxu1 %v2195_v30  ;;  %v2288_v30 = vld [vmem:[#allocation7 + $0x190] ss:$8 sps:$4 sm:$0xff]  }
  0xf8   :  { %1039 = vmatprep.subr.bf16.mxu1 %v2200_v31  ;;  %v2293_v31 = vld [vmem:[#allocation7 + $0x1a4] ss:$8 sps:$4 sm:$0xff]  }
  0xfb   :  { %1040 = vmatpush1.bf16.msra.mxu1 %v2198_v32  ;;  %v2291_v32 = vld [vmem:[#allocation7 + $0x1a0] ss:$8 sps:$4 sm:$0xff]  }
  0xfc   :  { %1041 = vmatprep.subr.bf16.mxu1 %v2203_v33  ;;  %v2296_v33 = vld [vmem:[#allocation7 + $0x1b4] ss:$8 sps:$4 sm:$0xff]  }
  0xff   :  { %1042 = vmatpush1.bf16.msra.mxu1 %v2201_v34  ;;  %v2294_v34 = vld [vmem:[#allocation7 + $0x1b0] ss:$8 sps:$4 sm:$0xff]  }
 0x100   :  { %1043 = vmatprep.subr.bf16.mxu1 %v2206_v35  ;;  %v2299_v35 = vld [vmem:[#allocation7 + $0x1c4] ss:$8 sps:$4 sm:$0xff]  }
 0x103   :  { %1044 = vmatpush1.bf16.msra.mxu1 %v2204_v36  ;;  %v2297_v36 = vld [vmem:[#allocation7 + $0x1c0] ss:$8 sps:$4 sm:$0xff]  }
 0x104   :  { %1045 = vmatprep.subr.bf16.mxu1 %v2209_v37  ;;  %v2302_v37 = vld [vmem:[#allocation7 + $0x1d4] ss:$8 sps:$4 sm:$0xff]  }
 0x107   :  { %1046 = vmatpush1.bf16.msra.mxu1 %v2207_v38  ;;  %v2300_v38 = vld [vmem:[#allocation7 + $0x1d0] ss:$8 sps:$4 sm:$0xff]  }
 0x108   :  { %1047 = vmatprep.subr.bf16.mxu1 %v2212_v39  ;;  %v2305_v39 = vld [vmem:[#allocation7 + $0x1e4] ss:$8 sps:$4 sm:$0xff]  }
 0x10b   :  { %1048 = vmatpush1.bf16.msra.mxu1 %v2210_v40  ;;  %v2303_v40 = vld [vmem:[#allocation7 + $0x1e0] ss:$8 sps:$4 sm:$0xff]  }
 0x10c   :  { %1969 = vmatprep.subr.bf16.mxu1 %v2309_v2 }
 0x10e   :  { %1050 = vmatmul.mubr.bf16.vlgmr.msra.gmra.mrb[4].mxu1 %v2539_v8  ;;  %v227_v8 = vrot.slane %v2554_v44, %v226_v45 }
 0x10f   :  { %1970 = vmatpush3.bf16.msra.mxu1 %v2310_v3 }
 0x110   :  { %1971 = vmatprep.subr.bf16.mxu1 %v2311_v4 }
 0x113   :  { %1972 = vmatpush3.bf16.msra.mxu1 %v2312_v7 }
 0x114   :  { %1973 = vmatprep.subr.bf16.mxu1 %v2313_v10 }
 0x117   :  { %1974 = vmatpush3.bf16.msra.mxu1 %v2314_v6 }
 0x118   :  { %1975 = vmatprep.subr.bf16.mxu1 %v2315_v13 }
 0x11b   :  { %1976 = vmatpush3.bf16.msra.mxu1 %v2316_v14 }
 0x11c   :  { %1977 = vmatprep.subr.bf16.mxu1 %v2317_v16 }
 0x11f   :  { %1978 = vmatpush3.bf16.msra.mxu1 %v2318_v18 }
 0x120   :  { %1979 = vmatprep.subr.bf16.mxu1 %v2319_v20 }
 0x123   :  { %1980 = vmatpush3.bf16.msra.mxu1 %v2320_v22 }
 0x161   :  { %v928_v47 = vpop.f32.mrb[0].mxu1 }
 0x162   :  { %v929_v48 = vadd.f32 %v928_v47, %v223_v46  ;;  %v930_v49 = vpop.f32.mrb[1].mxu1  ;;  %v2306_v46 = vld [vmem:[#allocation7 + $0x1f0] ss:$8 sps:$4 sm:$0xff]   ;;  %v234_v47 = vsub.s32 3, %v2546_v42 }
 0x163   :  { %v931_v50 = vadd.f32 %v930_v49, %v227_v8  ;;  %v932_v51 = vpop.f32.mrb[2].mxu1  ;;  %v969_v52 = vpop.f32.mrb[0].mxu0  ;;  %v230_v8 = vsub.s32 2, %v2546_v42 }
 0x164   :  { %v970_v54 = vadd.f32 %v969_v52, %v929_v48  ;;  %v933_v55 = vpop.f32.mrb[3].mxu1  ;;  %v971_v56 = vpop.f32.mrb[1].mxu0  ;;  %v235_v49 = vrot.slane %v2554_v44, %v234_v47 }
 0x165   :  { %v972_v57 = vadd.f32 %v971_v56, %v931_v50  ;;  %v973_v58 = vpop.f32.mrb[2].mxu0  ;;  %v231_v48 = vrot.slane %v2554_v44, %v230_v8  ;;  %v1130_v44 = vld [vmem:[%s2586_s4] sm:$0x3] }
 0x166   :  { %v1058_v59 = vmax.f32 %v970_v54, 0.0  ;;  %v974_v60 = vpop.f32.mrb[3].mxu0  ;;  %v1139_v2 = vrot.slane %v1130_v44, %v226_v45  ;;  %v1951_v45 = vld [vmem:[%s2588_s6] ss:$0 sm:$0xff] }
 0x167   :  { %v1059_v61 = vmax.f32 %v972_v57, 0.0 }
 0x168   :  { %v1062_v62 = vpack.c.bf16 %v1058_v59, %v1058_v59 }
 0x169   :  { %v1063_v63 = vpack.c.bf16 %v1059_v61, %v1059_v61  ;;  %v2321_v61 = vld [vmem:[#allocation8 + $0x70] sm:$0xff]  }
 0x16a   :  { %1981 = vmatprep.subr.bf16.mxu1 %v2321_v61 }
 0x16b   :  { %1494 = vmatprep.mubr.bf16.mxu0 %v1063_v63  ;;  %v2323_v63 = vld [vmem:[#allocation8 + $0x78] sm:$0xff]  }
 0x16c   :  { %1495 = vmatmul.mubr.bf16.vlgmr.msra.gmra.mrb[4].mxu0 %v1062_v62  ;;  %v2322_v62 = vld [vmem:[#allocation8 + $0x30] sm:$0xff]  }
 0x16d   :  { %1504 = vmatpush1.bf16.msra.mxu0 %v2261_v0  ;;  %1982 = vmatpush3.bf16.msra.mxu1 %v2322_v62  ;;  %v2324_v0 = vld [vmem:[#allocation8 + $0x38] sm:$0xff]  }
 0x16e   :  { %1505 = vmatprep.subr.bf16.mxu0 %v2266_v1  ;;  %1983 = vmatprep.subr.bf16.mxu1 %v2323_v63  ;;  %v1135_v1 = vrot.slane %v1130_v44, %v2549_v43 }
 0x171   :  { %1506 = vmatpush1.bf16.msra.mxu0 %v2264_v5  ;;  %1984 = vmatpush3.bf16.msra.mxu1 %v2324_v0 }
 0x172   :  { %1507 = vmatprep.subr.bf16.mxu0 %v2269_v9 }
 0x175   :  { %1508 = vmatpush1.bf16.msra.mxu0 %v2267_v11 }
 0x176   :  { %1509 = vmatprep.subr.bf16.mxu0 %v2272_v12 }
 0x179   :  { %1510 = vmatpush1.bf16.msra.mxu0 %v2270_v53  ;;  %v1724_v53 = vld [vmem:[%s2589_s7] sm:$0x1] }
 0x17a   :  { %1511 = vmatprep.subr.bf16.mxu0 %v2275_v15  ;;  %v1725_v15 = vunpack.c.l.bf16 %v1724_v53 }
 0x17c   :  { %v1729_v20 = vrot.slane %v1725_v15, %v2549_v43 }
 0x17d   :  { %1512 = vmatpush1.bf16.msra.mxu0 %v2273_v17 }
 0x17e   :  { %1513 = vmatprep.subr.bf16.mxu0 %v2278_v19 }
 0x181   :  { %1514 = vmatpush1.bf16.msra.mxu0 %v2276_v21 }
 0x182   :  { %1515 = vmatprep.subr.bf16.mxu0 %v2281_v23  ;;  %v1968_v23 = vld [vmem:[#allocation2] ss:$0 sm:$0xff] }
 0x185   :  { %1516 = vmatpush1.bf16.msra.mxu0 %v2279_v24 }
 0x186   :  { %1517 = vmatprep.subr.bf16.mxu0 %v2284_v25 }
 0x189   :  { %1518 = vmatpush1.bf16.msra.mxu0 %v2282_v26 }
 0x18a   :  { %1519 = vmatprep.subr.bf16.mxu0 %v2287_v27 }
 0x18d   :  { %1520 = vmatpush1.bf16.msra.mxu0 %v2285_v28 }
 0x18e   :  { %1521 = vmatprep.subr.bf16.mxu0 %v2290_v29 }
 0x191   :  { %1522 = vmatpush1.bf16.msra.mxu0 %v2288_v30 }
 0x192   :  { %1523 = vmatprep.subr.bf16.mxu0 %v2293_v31 }
 0x195   :  { %1524 = vmatpush1.bf16.msra.mxu0 %v2291_v32 }
 0x196   :  { %1525 = vmatprep.subr.bf16.mxu0 %v2296_v33 }
 0x199   :  { %1526 = vmatpush1.bf16.msra.mxu0 %v2294_v34 }
 0x19a   :  { %1527 = vmatprep.subr.bf16.mxu0 %v2299_v35 }
 0x19d   :  { %1528 = vmatpush1.bf16.msra.mxu0 %v2297_v36 }
 0x19e   :  { %1529 = vmatprep.subr.bf16.mxu0 %v2302_v37 }
 0x1a1   :  { %1530 = vmatpush1.bf16.msra.mxu0 %v2300_v38 }
 0x1a2   :  { %1531 = vmatprep.subr.bf16.mxu0 %v2305_v39 }
 0x1a5   :  { %1532 = vmatpush1.bf16.msra.mxu0 %v2303_v40 }
 0x1a6   :  { %1533 = vmatprep.subr.bf16.mxu0 %v2308_v41 }
 0x1a9   :  { %1534 = vmatpush1.bf16.msra.mxu0 %v2306_v46 }
 0x1e1   :  { %v1051_v50 = vpop.f32.mrb[4].mxu1 }
 0x1e2   :  { %v1995_v51 = vadd.f32 %v1051_v50, %v231_v48  ;;  %v1053_v52 = vpop.f32.mrb[5].mxu1 }
 0x1e3   :  { %v1996_v54 = vadd.f32 %v1053_v52, %v235_v49  ;;  %v1055_v55 = vpop.f32.mrb[6].mxu1 }
 0x1e4   :  { %v1060_v56 = vmax.f32 %v1995_v51, 0.0  ;;  %v1056_v57 = vpop.f32.mrb[7].mxu1 }
 0x1e5   :  { %v1061_v58 = vmax.f32 %v1996_v54, 0.0 }
 0x1e6   :  { %v1064_v60 = vpack.c.bf16 %v1060_v56, %v1060_v56 }
 0x1e7   :  { %v1065_v59 = vpack.c.bf16 %v1061_v58, %v1061_v58 }
 0x1e9   :  { %1535 = vmatprep.mubr.bf16.mxu0 %v1065_v59 }
 0x1ea   :  { %1536 = vmatmul.mubr.bf16.vlgmr.msra.gmra.mrb[4].mxu0 %v1064_v60 }
 0x2bd   :  { %v1537_v3 = vpop.f32.mrb[4].mxu0 }
 0x2be   :  { %v1997_v4 = vadd.f32 %v1537_v3, %v1135_v1  ;;  %v1539_v5 = vpop.f32.mrb[5].mxu0 }
 0x2bf   :  { %v1998_v7 = vadd.f32 %v1539_v5, %v1139_v2  ;;  %v1541_v9 = vpop.f32.mrb[6].mxu0 }
 0x2c0   :  { %v1544_v10 = vmax.f32 %v1997_v4, 0.0  ;;  %v1542_v11 = vpop.f32.mrb[7].mxu0 }
 0x2c1   :  { %v1545_v6 = vmax.f32 %v1998_v7, 0.0 }
 0x2c2   :  { %v1546_v13 = vpack.c.bf16 %v1544_v10, %v1544_v10 }
 0x2c3   :  { %v1547_v12 = vpack.c.bf16 %v1545_v6, %v1545_v6 }
 0x2c5   :  { %1715 = vmatprep.mubr.bf16.mxu1 %v1547_v12 }
 0x2c6   :  { %1716 = vmatmul.mubr.bf16.vlgmr.msra.gmra.mrb[8].mxu1 %v1546_v13 }
 0x399   :  { %v1985_v14 = vpop.f32.mrb[8].mxu1 }
 0x39a   :  { %v1986_v42 = vpop.f32.mrb[9].mxu1 }
 0x39b   :  { %v1987_v16 = vadd.f32 %v1986_v42, %v1985_v14  ;;  %v1988_v17 = vpop.f32.mrb[10].mxu1 }
 0x39c   :  { %v1989_v18 = vpop.f32.mrb[11].mxu1 }
 0x39d   :  { %v1718_v19 = vadd.f32 %v1987_v16, %v1951_v45 }
 0x39f   :  { %v1723_v21 = vmax.f32 %v1718_v19, 0.0 }
 0x3a1   :  { %v1730_v22 = vmul.f32 %v1729_v20, %v1723_v21 }
 0x3a3   :  { %1731 = vadd.xlane.f32.xlu0 %v1730_v22 }
 0x430   :  { %v1732_v24 = vpop.xlane.xlu0 %1731 }
 0x431   :  { %v1740_v25 = vadd.f32 %v1968_v23, %v1732_v24 }
 0x433   :  { %v1741_v26 = vsub.f32 0.0, %v1740_v25 }
 0x435   :  { %v1742_v27 = vmul.f32 1.442695, %v1741_v26 }
 0x437   :  { %2325 = vpow2.f32 %v1742_v27 }
 0x441   :  { %v2326_v28 = vpop.eup %2325 }
 0x442   :  { %v1744_v29 = vadd.f32 1.0, %v2326_v28 }
 0x444   :  { %2327 = vrcp.f32 %v1744_v29 }
 0x44e   :  { %v2328_v30 = vpop.eup %2327 }
 0x44f   :  { %1747 = vst.msk [vmem:[%s2591_s9] sm:$0xff] %vm1746_vm0, %v2328_v30 }
 0x450   :  { %1752 = vsyncpa [#allocation4], 1 }
 0x451   :  { %1753 = vsyncpa [#allocation6], 1 }
 0x452   :  { %1754 = vsyncpa [#allocation9], 1 }

</bundles_post_ra>
